<compile_context>
chip_gen: v6e
topology: v6e:2x2x1
jax: 0.10.0
libtpu: 0.0.40
codegen_flags: <defaults>
</compile_context>

<pallas_src>
import functools

import jax
import jax.numpy as jnp
from jax.experimental import pallas as pl
from jax.experimental.pallas import tpu as pltpu

_LANE = 128      # vreg lane width / MXU-friendly feature multiple
_SUBLANE = 8     # vreg sublane width
_MAX_TILE_B = 512


def _round_up(n, m):
    return (n + m - 1) // m * m


def _choose_tiling(batch):
    """Pick (padded_batch, batch_tile).

    * tile is a sublane (8) multiple,
    * >= 2 grid steps whenever the batch allows it, so the "parallel" batch
      axis shards across both v7x TensorCores,
    * tile capped at 512 rows: big enough to amortise per-grid-step overhead
      (~85% of HBM roofline at 512 vs ~29% at 128), small enough that the
      double-buffered x/out tiles stay tiny even in v7x's 64 MiB VMEM.
    """
    bp = _round_up(max(batch, _SUBLANE), _SUBLANE)
    if bp <= _SUBLANE:
        return bp, bp
    tile_b = min(_MAX_TILE_B, _round_up(-(-bp // 2), _SUBLANE))
    bp = _round_up(bp, tile_b)
    return bp, tile_b


# ----------------------------------------------------------------------------
# Kernel: fused  (x @ W1 + b1) -> ReLU -> (h @ W2 + b2)   (one or many heads,
# depending on how W2/b2 were packed).
# x_ref:  (TILE_B, INp)   w1_ref: (INp, Hp)   w2_ref: (Hp, Op)
# b_ref:  (2, BW) f32, row 0 = b1 (first Hp lanes), row 1 = b2 (first Op lanes)
# o_ref:  (TILE_B, Op)    all padded dims are multiples of 128 -> lane-dense.
# ----------------------------------------------------------------------------
def _fused_mlp_kernel(x_ref, w1_ref, w2_ref, b_ref, o_ref):
    hp = w1_ref.shape[1]
    op = w2_ref.shape[1]
    # Layer 1 on the MXU with f32 accumulation; bias + ReLU on the VPU.
    h = jnp.dot(x_ref[...], w1_ref[...], preferred_element_type=jnp.float32)
    h = jnp.maximum(h + b_ref[0:1, :hp], 0.0)
    # Layer 2 (selected / packed heads), f32 accumulation, bias epilogue.
    o = jnp.dot(h.astype(w2_ref.dtype), w2_ref[...],
                preferred_element_type=jnp.float32)
    o_ref[...] = (o + b_ref[1:2, :op]).astype(o_ref.dtype)


@functools.partial(
    jax.jit, static_argnames=("out_features", "compute_dtype", "out_dtype"))
def _fused_mlp_forward(x, w1p, w2p, bias, out_features, compute_dtype,
                       out_dtype):
    """Run the fused MLP kernel on pre-padded parameters."""
    B, IN = x.shape
    INp, Hp = w1p.shape
    Op = w2p.shape[1]

    Bp, tile_b = _choose_tiling(B)

    # Skip the pad entirely when x is already aligned and in compute dtype
    # (avoids an extra HBM read+write of x around the kernel).
    if (B, IN) == (Bp, INp) and x.dtype == jnp.dtype(compute_dtype):
        xp = x
    else:
        xp = jnp.pad(x.astype(compute_dtype), ((0, Bp - B), (0, INp - IN)))

    itemsize = jnp.dtype(compute_dtype).itemsize
    cost = pl.CostEstimate(
        flops=2 * Bp * INp * Hp + 2 * Bp * Hp * Op,
        transcendentals=0,
        bytes_accessed=(Bp * INp * itemsize + INp * Hp * itemsize
                        + Hp * Op * itemsize + bias.size * 4
                        + Bp * Op * jnp.dtype(out_dtype).itemsize))

    out = pl.pallas_call(
        _fused_mlp_kernel,
        out_shape=jax.ShapeDtypeStruct((Bp, Op), out_dtype),
        grid_spec=pltpu.PrefetchScalarGridSpec(
            num_scalar_prefetch=0,
            grid=(Bp // tile_b,),
            in_specs=[
                # x: tiled over batch (double-buffered by BlockSpec).
                pl.BlockSpec((tile_b, INp), lambda i: (i, 0)),
                # Weights / bias: constant index_map -> fetched once, stay
                # VMEM-resident across batch tiles.
                # TODO(synk): for real (large) INp/Hp on v7x (64 MiB VMEM),
                # single-buffer these (pipeline_mode=pl.Buffered(1)) or K-tile.
                pl.BlockSpec((INp, Hp), lambda i: (0, 0)),
                pl.BlockSpec((Hp, Op), lambda i: (0, 0)),
                pl.BlockSpec(bias.shape, lambda i: (0, 0)),
            ],
            out_specs=pl.BlockSpec((tile_b, Op), lambda i: (i, 0)),
        ),
        compiler_params=pltpu.CompilerParams(
            dimension_semantics=("parallel",)),  # shards batch across TCs (v7x)
        cost_estimate=cost,
    )(xp, w1p, w2p, bias)

    # Strip lane/sublane padding outside the kernel (no-op if already exact).
    if Bp != B or Op != out_features:
        out = out[:B, :out_features]
    return out


# ----------------------------------------------------------------------------
# Inner multi-output model (representative stand-in for the abstract `model`).
# Parameters are zero-padded to MXU/lane-friendly shapes ONCE at construction.
# ----------------------------------------------------------------------------
class TwoHeadMLP:
    """Shared trunk + N linear heads.  compute_dtype=bf16 recommended on TPU."""

    def __init__(self, w1, b1, heads, compute_dtype=jnp.bfloat16,
                 out_dtype=None):
        IN, H = w1.shape
        self.compute_dtype = compute_dtype
        self.out_dtype = compute_dtype if out_dtype is None else out_dtype

        INp = _round_up(IN, _LANE)
        Hp = _round_up(H, _LANE)
        self.w1p = (jnp.zeros((INp, Hp), compute_dtype)
                    .at[:IN, :H].set(w1.astype(compute_dtype)))
        b1_flat = b1.reshape(-1).astype(jnp.float32)

        # Per-head padded params (static single-head selection path).
        self.heads = []
        # Combined params for the full multi-output forward: W2 heads packed
        # along the output dim -> trunk computed once, one kernel launch.
        col, w2_cols, b2_cols, self.head_slices = 0, [], [], []
        for (w2, b2) in heads:
            O = w2.shape[1]
            Op = _round_up(O, _LANE)
            w2p = (jnp.zeros((Hp, Op), compute_dtype)
                   .at[:H, :O].set(w2.astype(compute_dtype)))
            bw = max(Hp, Op)
            bias = jnp.zeros((2, bw), jnp.float32)
            bias = bias.at[0, :H].set(b1_flat)
            bias = bias.at[1, :O].set(b2.reshape(-1).astype(jnp.float32))
            self.heads.append((w2p, bias, O))

            w2_cols.append(w2p)
            b2_cols.append(jnp.zeros((Op,), jnp.float32)
                           .at[:O].set(b2.reshape(-1).astype(jnp.float32)))
            self.head_slices.append((col, O))
            col += Op

        self.w2_all = jnp.concatenate(w2_cols, axis=1)        # (Hp, sum Opk)
        total = self.w2_all.shape[1]
        bw = max(Hp, total)
        bias_all = jnp.zeros((2, bw), jnp.float32)
        bias_all = bias_all.at[0, :H].set(b1_flat)
        bias_all = bias_all.at[1, :total].set(jnp.concatenate(b2_cols))
        self.bias_all = bias_all

    def forward_head(self, x, index):
        """Compute exactly one head (used when the selecting index is static)."""
        w2p, bias, O = self.heads[index]
        return _fused_mlp_forward(x, self.w1p, w2p, bias, out_features=O,
                                  compute_dtype=self.compute_dtype,
                                  out_dtype=self.out_dtype)

    def __call__(self, x):
        """Full multi-output forward: ONE fused kernel launch for all heads."""
        total = self.w2_all.shape[1]
        full = _fused_mlp_forward(x, self.w1p, self.w2_all, self.bias_all,
                                  out_features=total,
                                  compute_dtype=self.compute_dtype,
                                  out_dtype=self.out_dtype)
        return tuple(full[:, off:off + O] for (off, O) in self.head_slices)


# ----------------------------------------------------------------------------
# SingleOutputModel equivalent.
# ----------------------------------------------------------------------------
class SingleOutputModelPallas:
    """JAX/Pallas equivalent of the PyTorch SingleOutputModel wrapper."""

    def __init__(self, model, index):
        self.model = model
        self.index = index

    def __call__(self, x):
        # `index` is static Python (same as the torch module attribute), so
        # only the selected head's kernel is launched; the unused heads are
        # never computed or written back.
        if hasattr(self.model, "forward_head"):
            return self.model.forward_head(x, self.index)
        # TODO(synk): a *traced* index would need lax.switch over heads here.
        return self.model(x)[self.index]


if __name__ == "__main__":
    # Small, deterministic shapes: batch=8, in_features=32, hidden=64, out=16.
    B, IN, H, O = 8, 32, 64, 16
    key = jax.random.PRNGKey(0)
    kx, k1, k2, k3, kx2 = jax.random.split(key, 5)

    x = jax.random.normal(kx, (B, IN), dtype=jnp.float32)
    w1 = jax.random.normal(k1, (IN, H), dtype=jnp.float32) * 0.1
    b1 = jnp.zeros((1, H), dtype=jnp.float32)
    w2a = jax.random.normal(k2, (H, O), dtype=jnp.float32) * 0.1
    b2a = jnp.full((1, O), 0.01, dtype=jnp.float32)
    w2b = jax.random.normal(k3, (H, O), dtype=jnp.float32) * 0.1
    b2b = jnp.full((1, O), -0.01, dtype=jnp.float32)

    def ref_heads(xv):
        hp = jnp.maximum(
            jnp.dot(xv, w1, precision=jax.lax.Precision.HIGHEST) + b1, 0.0)
        r0 = jnp.dot(hp, w2a, precision=jax.lax.Precision.HIGHEST) + b2a
        r1 = jnp.dot(hp, w2b, precision=jax.lax.Precision.HIGHEST) + b2b
        return r0, r1

    ref0, ref1 = ref_heads(x)

    # ---- f32 configuration: exact-ish check against the reference. --------
    inner_f32 = TwoHeadMLP(w1, b1, [(w2a, b2a), (w2b, b2b)],
                           compute_dtype=jnp.float32, out_dtype=jnp.float32)
    out0 = SingleOutputModelPallas(inner_f32, index=0)(x)
    out1 = SingleOutputModelPallas(inner_f32, index=1)(x)
    jax.block_until_ready((out0, out1))
    assert out0.shape == (B, O) and out1.shape == (B, O)
    assert jnp.allclose(out0, ref0, atol=1e-4, rtol=1e-4)
    assert jnp.allclose(out1, ref1, atol=1e-4, rtol=1e-4)

    # Fused multi-head forward (one kernel launch for both heads).
    both = inner_f32(x)
    jax.block_until_ready(both)
    assert jnp.allclose(both[0], ref0, atol=1e-4, rtol=1e-4)
    assert jnp.allclose(both[1], ref1, atol=1e-4, rtol=1e-4)

    # Larger batch: exercises grid >= 2 (both v7x TensorCores) and padding.
    B2 = 96
    x2 = jax.random.normal(kx2, (B2, IN), dtype=jnp.float32)
    ref0_b, _ = ref_heads(x2)
    out0_b = SingleOutputModelPallas(inner_f32, index=0)(x2)
    jax.block_until_ready(out0_b)
    assert out0_b.shape == (B2, O)
    assert jnp.allclose(out0_b, ref0_b, atol=1e-4, rtol=1e-4)

    # ---- bf16 configuration (recommended on v5e/v6e/v7x): loose check. ----
    inner_bf16 = TwoHeadMLP(w1, b1, [(w2a, b2a), (w2b, b2b)],
                            compute_dtype=jnp.bfloat16)
    out0_bf = SingleOutputModelPallas(inner_bf16, index=0)(x)
    jax.block_until_ready(out0_bf)
    assert out0_bf.dtype == jnp.bfloat16
    assert jnp.allclose(out0_bf.astype(jnp.float32), ref0, atol=5e-2, rtol=5e-2)

    print("KERNEL_OK")
</pallas_src>

<mosaic_0001>
module attributes {stable_mosaic.version = 11 : i64} {
  func.func @_fused_mlp_kernel(%arg0: i32, %arg1: memref<8x128xf32, #tpu.memory_space<vmem>>, %arg2: memref<128x128xf32, #tpu.memory_space<vmem>>, %arg3: memref<128x128xf32, #tpu.memory_space<vmem>>, %arg4: memref<2x128xf32, #tpu.memory_space<vmem>>, %arg5: memref<8x128xf32, #tpu.memory_space<vmem>>) attributes {dimension_semantics = [#tpu.dimension_semantics<parallel>], iteration_bounds = array<i64: 1>, scalar_prefetch = 0 : i64, scratch_operands = 0 : i64, tpu.core_type = #tpu.core_type<tc>, window_params = [{transform_indices = @transform_0, window_bounds = array<i64: 8, 128>}, {pipeline_mode = #tpu.pipeline_mode<synchronous>, transform_indices = @transform_1, window_bounds = array<i64: 128, 128>}, {pipeline_mode = #tpu.pipeline_mode<synchronous>, transform_indices = @transform_2, window_bounds = array<i64: 128, 128>}, {pipeline_mode = #tpu.pipeline_mode<synchronous>, transform_indices = @transform_3, window_bounds = array<i64: 2, 128>}, {transform_indices = @transform_4, window_bounds = array<i64: 8, 128>}]} {
    %c0 = arith.constant 0 : index
    %c0_0 = arith.constant 0 : index
    %0 = vector.load %arg1[%c0, %c0_0] : memref<8x128xf32, #tpu.memory_space<vmem>>, vector<8x128xf32>
    %c0_1 = arith.constant 0 : index
    %c0_2 = arith.constant 0 : index
    %1 = vector.load %arg2[%c0_1, %c0_2] : memref<128x128xf32, #tpu.memory_space<vmem>>, vector<128x128xf32>
    %cst = arith.constant dense<0.000000e+00> : vector<8x128xf32>
    %2 = tpu.matmul %0, %1, %cst {dimension_numbers = #tpu.dot_dimension_numbers<[1], [0], [0], [1], [0, 0, 1, 1], [], []>} : vector<8x128xf32>, vector<128x128xf32>, vector<8x128xf32> -> vector<8x128xf32>
    %c0_3 = arith.constant 0 : index
    %c0_4 = arith.constant 0 : index
    %3 = vector.load %arg4[%c0_3, %c0_4] : memref<2x128xf32, #tpu.memory_space<vmem>>, vector<1x128xf32>
    %4 = vector.broadcast %3 : vector<1x128xf32> to vector<8x128xf32>
    %5 = arith.addf %2, %4 : vector<8x128xf32>
    %cst_5 = arith.constant 0.000000e+00 : f32
    %6 = vector.broadcast %cst_5 : f32 to vector<8x128xf32>
    %7 = arith.maximumf %5, %6 : vector<8x128xf32>
    %c0_6 = arith.constant 0 : index
    %c0_7 = arith.constant 0 : index
    %8 = vector.load %arg3[%c0_6, %c0_7] : memref<128x128xf32, #tpu.memory_space<vmem>>, vector<128x128xf32>
    %cst_8 = arith.constant dense<0.000000e+00> : vector<8x128xf32>
    %9 = tpu.matmul %7, %8, %cst_8 {dimension_numbers = #tpu.dot_dimension_numbers<[1], [0], [0], [1], [0, 0, 1, 1], [], []>} : vector<8x128xf32>, vector<128x128xf32>, vector<8x128xf32> -> vector<8x128xf32>
    %c1 = arith.constant 1 : index
    %c0_9 = arith.constant 0 : index
    %10 = vector.load %arg4[%c1, %c0_9] : memref<2x128xf32, #tpu.memory_space<vmem>>, vector<1x128xf32>
    %11 = vector.broadcast %10 : vector<1x128xf32> to vector<8x128xf32>
    %12 = arith.addf %9, %11 : vector<8x128xf32>
    %c0_10 = arith.constant 0 : index
    %c0_11 = arith.constant 0 : index
    %13 = vector.load %arg5[%c0_10, %c0_11] : memref<8x128xf32, #tpu.memory_space<vmem>>, vector<8x128xf32>
    tpu.vector_store %arg5[%c0_10, %c0_11], %12 {strides = array<i32>} : memref<8x128xf32, #tpu.memory_space<vmem>>, vector<8x128xf32>,
    return
  }
  func.func @transform_0(%arg0: i32) -> (i32, i32) {
    %c0_i32 = arith.constant 0 : i32
    %c0_i32_0 = arith.constant 0 : i32
    return %arg0, %c0_i32 : i32, i32
  }
  func.func @transform_1(%arg0: i32) -> (i32, i32) {
    %c0_i32 = arith.constant 0 : i32
    %c0_i32_0 = arith.constant 0 : i32
    %c0_i32_1 = arith.constant 0 : i32
    return %c0_i32, %c0_i32_0 : i32, i32
  }
  func.func @transform_2(%arg0: i32) -> (i32, i32) {
    %c0_i32 = arith.constant 0 : i32
    %c0_i32_0 = arith.constant 0 : i32
    %c0_i32_1 = arith.constant 0 : i32
    return %c0_i32, %c0_i32_0 : i32, i32
  }
  func.func @transform_3(%arg0: i32) -> (i32, i32) {
    %c0_i32 = arith.constant 0 : i32
    %c0_i32_0 = arith.constant 0 : i32
    %c0_i32_1 = arith.constant 0 : i32
    return %c0_i32, %c0_i32_0 : i32, i32
  }
  func.func @transform_4(%arg0: i32) -> (i32, i32) {
    %c0_i32 = arith.constant 0 : i32
    %c0_i32_0 = arith.constant 0 : i32
    return %arg0, %c0_i32 : i32, i32
  }
}

</mosaic_0001>

<bundles_post_ra>
// kernel: _fused_mlp_forward.1
= control target key start
LH: loop header
LB: loop body
LE: loop exit
PB: predicated region body
PF: predicated region fallthrough
CT: control target
= control target key end

     0   :  { %9 = vsyncpa [#allocation3], 0  ;;  %s510_s0 = inlined_call_operand.vmem [shape: f32[8,128], index: 0, kind: input, shape index: {}]   ;;  %s511_s1 = inlined_call_operand.hbm [shape: f32[128,128], index: 1, kind: input, shape index: {}]   ;;  %s512_s2 = inlined_call_operand.hbm [shape: f32[128,128], index: 2, kind: input, shape index: {}]   ;;  %s513_s3 = inlined_call_operand.vmem [shape: f32[2,128], index: 3, kind: input, shape index: {}]   ;;  %s514_s4 = inlined_call_operand.hbm [shape: f32[8,128], index: 4, kind: output, shape index: {}]  }
   0x1   :  { %10 = vsyncpa [#allocation6], 0 }
   0x2   :  { %11 = vsyncpa [#allocation4], 0  ;;  %s426_s15 = smov [#allocation2]  }
   0x3   :  { %s19_s16 = sshll.u32 %s426_s15, 4  ;;  %s20_s16 = int_to_ptr.vmem [resolvable:$true] %s19_s16 }
   0x4   :  { %s368_s17 = scalar_lea.vmem %s20_s16, 2048  ;;  %p373_p1 = scmp.lt.s32.totalorder %s20_s16, %s20_s16 }
   0x5   :  { %p369_p0 = scmp.ne.s32.totalorder %s20_s16, %s368_s17  ;;  %p374_p2 = scmp.lt.s32.totalorder %s368_s17, %s368_s17 }
   0x7   :  { %p375_p3 = por %p374_p2, %p373_p1 }
   0x9   :  { %p376_p4 = pnand %p375_p3, %p369_p0 }
   0xb   :  { %379 = shalt.err (!%p376_p4)
}
   0xc   :  { %s427_s18 = smov 128   ;;  %s428_s19 = smov 8  }
   0xd   :  { %25 = dma.hbm_to_vmem [thread:$0]  %s511_s1, 2048, %s20_s16, [#allocation3], %s427_s18, %s427_s18, %s428_s19  }
   0xe   :  { %s429_s22 = smov [#allocation5]  }
   0xf   :  { %s31_s23 = sshll.u32 %s429_s22, 4  ;;  %s32_s23 = int_to_ptr.vmem [resolvable:$true] %s31_s23 }
  0x10   :  { %s388_s24 = scalar_lea.vmem %s32_s23, 2048  ;;  %p393_p6 = scmp.lt.s32.totalorder %s32_s23, %s32_s23 }
  0x11   :  { %p389_p5 = scmp.ne.s32.totalorder %s32_s23, %s388_s24  ;;  %p394_p7 = scmp.lt.s32.totalorder %s388_s24, %s388_s24 }
  0x13   :  { %p395_p8 = por %p394_p7, %p393_p6 }
  0x15   :  { %p396_p9 = pnand %p395_p8, %p389_p5 }
  0x17   :  { %399 = shalt.err (!%p396_p9)
}
  0x18   :  { %37 = dma.hbm_to_vmem [thread:$0]  %s512_s2, 2048, %s32_s23, [#allocation6], %s427_s18, %s427_s18, %s428_s19  }
  0x19   :  { %420 = dma.done.wait [#allocation3], 2048  }
  0x1a   :  { %421 = vsyncadd [#allocation3], 4294965248 }
  0x1b   :  { %422 = dma.done.wait [#allocation6], 2048  }
  0x1c   :  { %423 = vsyncadd [#allocation6], 4294965248  ;;  %v430_v0 = vmov 0.0   ;;  %vm431_vm0 = vmmov 0   ;;  %v62_v1 = vld [vmem:[#allocation2 + $0x78] sm:$0xff]  ;;  %v61_v2 = vld [vmem:[#allocation2 + $0x70] sm:$0xff] }
  0x1d   :  { %283 = vmatprep.subr.mxu0 %v430_v0  ;;  %315 = vmatprep.mubr.msk.f32.mxu0 %vm431_vm0, %v430_v0  ;;  %v60_v3 = vld [vmem:[#allocation2 + $0x68] sm:$0xff]  ;;  %v59_v4 = vld [vmem:[#allocation2 + $0x60] sm:$0xff]  ;;  %v154_v5 = vld [vmem:[#allocation5 + $0x78] sm:$0xff]  ;;  %s432_s30 = smov [#allocation7]  }
  0x1e   :  { %318 = vmatprep.subr.mxu1 %v430_v0  ;;  %350 = vmatprep.mubr.msk.f32.mxu1 %vm431_vm0, %v430_v0  ;;  %v58_v6 = vld [vmem:[#allocation2 + $0x58] sm:$0xff]  ;;  %v153_v7 = vld [vmem:[#allocation5 + $0x70] sm:$0xff]  ;;  %v152_v8 = vld [vmem:[#allocation5 + $0x68] sm:$0xff]  ;;  %s237_s5 = sshll.u32 %s432_s30, 4  ;;  %s238_s5 = int_to_ptr.vmem [resolvable:$true] %s237_s5 }
  0x1f   :  { %284 = vmatpush3.msra.mxu0 %v62_v1  ;;  %319 = vmatpush3.msra.mxu1 %v154_v5  ;;  %v57_v9 = vld [vmem:[#allocation2 + $0x50] sm:$0xff]  ;;  %v151_v10 = vld [vmem:[#allocation5 + $0x60] sm:$0xff]  ;;  %v56_v11 = vld [vmem:[#allocation2 + $0x48] sm:$0xff]  ;;  %s400_s6 = scalar_lea.vmem %s238_s5, 128  ;;  %p405_p11 = scmp.lt.s32.totalorder %s238_s5, %s238_s5 }
  0x20   :  { %285 = vmatprep.subr.mxu0 %v430_v0  ;;  %320 = vmatprep.subr.mxu1 %v430_v0  ;;  %v150_v12 = vld [vmem:[#allocation5 + $0x58] sm:$0xff]  ;;  %v55_v13 = vld [vmem:[#allocation2 + $0x40] sm:$0xff]  ;;  %v149_v14 = vld [vmem:[#allocation5 + $0x50] sm:$0xff]  ;;  %p401_p10 = scmp.ne.s32.totalorder %s238_s5, %s400_s6  ;;  %p406_p12 = scmp.lt.s32.totalorder %s400_s6, %s400_s6 }
  0x21   :  { %286 = vmatpush3.msra.mxu0 %v61_v2  ;;  %321 = vmatpush3.msra.mxu1 %v153_v7  ;;  %v54_v15 = vld [vmem:[#allocation2 + $0x38] sm:$0xff]  ;;  %v148_v16 = vld [vmem:[#allocation5 + $0x48] sm:$0xff]  ;;  %v53_v17 = vld [vmem:[#allocation2 + $0x30] sm:$0xff] }
  0x22   :  { %287 = vmatprep.subr.mxu0 %v430_v0  ;;  %322 = vmatprep.subr.mxu1 %v430_v0  ;;  %v147_v18 = vld [vmem:[#allocation5 + $0x40] sm:$0xff]  ;;  %v52_v19 = vld [vmem:[#allocation2 + $0x28] sm:$0xff]  ;;  %v146_v20 = vld [vmem:[#allocation5 + $0x38] sm:$0xff]  ;;  %p407_p13 = por %p406_p12, %p405_p11 }
  0x23   :  { %288 = vmatpush3.msra.mxu0 %v60_v3  ;;  %323 = vmatpush3.msra.mxu1 %v152_v8  ;;  %v51_v21 = vld [vmem:[#allocation2 + $0x20] sm:$0xff]  ;;  %v145_v22 = vld [vmem:[#allocation5 + $0x30] sm:$0xff]  ;;  %v50_v23 = vld [vmem:[#allocation2 + $0x18] sm:$0xff] }
  0x24   :  { %289 = vmatprep.subr.mxu0 %v430_v0  ;;  %324 = vmatprep.subr.mxu1 %v430_v0  ;;  %v144_v24 = vld [vmem:[#allocation5 + $0x28] sm:$0xff]  ;;  %v49_v25 = vld [vmem:[#allocation2 + $0x10] sm:$0xff]  ;;  %v143_v26 = vld [vmem:[#allocation5 + $0x20] sm:$0xff]  ;;  %p408_p0 = pnand %p407_p13, %p401_p10 }
  0x25   :  { %290 = vmatpush3.msra.mxu0 %v59_v4  ;;  %325 = vmatpush3.msra.mxu1 %v151_v10  ;;  %v48_v27 = vld [vmem:[#allocation2 + $0x8] sm:$0xff]  ;;  %v142_v28 = vld [vmem:[#allocation5 + $0x18] sm:$0xff]  ;;  %v47_v29 = vld [vmem:[#allocation2] sm:$0xff] }
  0x26   :  { %291 = vmatprep.subr.mxu0 %v430_v0  ;;  %326 = vmatprep.subr.mxu1 %v430_v0  ;;  %v46_v30 = vld [vmem:[%s510_s0] sm:$0xff]  ;;  %v141_v31 = vld [vmem:[#allocation5 + $0x10] sm:$0xff]  ;;  %v140_v32 = vld [vmem:[#allocation5 + $0x8] sm:$0xff] }
  0x27   :  { %292 = vmatpush3.msra.mxu0 %v58_v6  ;;  %327 = vmatpush3.msra.mxu1 %v150_v12  ;;  %v139_v33 = vld [vmem:[#allocation5] sm:$0xff] }
  0x28   :  { %293 = vmatprep.subr.mxu0 %v430_v0  ;;  %328 = vmatprep.subr.mxu1 %v430_v0  ;;  %v247_v34 = vld [vmem:[%s513_s3] ss:$0 sm:$0xff]  ;;  %v248_v39 = vld [vmem:[%s513_s3 + $0x1] ss:$0 sm:$0xff] }
  0x29   :  { %294 = vmatpush3.msra.mxu0 %v57_v9  ;;  %329 = vmatpush3.msra.mxu1 %v149_v14 }
  0x2a   :  { %295 = vmatprep.subr.mxu0 %v430_v0  ;;  %330 = vmatprep.subr.mxu1 %v430_v0 }
  0x2b   :  { %296 = vmatpush3.msra.mxu0 %v56_v11  ;;  %331 = vmatpush3.msra.mxu1 %v148_v16 }
  0x2c   :  { %297 = vmatprep.subr.mxu0 %v430_v0  ;;  %332 = vmatprep.subr.mxu1 %v430_v0 }
  0x2d   :  { %298 = vmatpush3.msra.mxu0 %v55_v13  ;;  %333 = vmatpush3.msra.mxu1 %v147_v18 }
  0x2e   :  { %299 = vmatprep.subr.mxu0 %v430_v0  ;;  %334 = vmatprep.subr.mxu1 %v430_v0 }
  0x2f   :  { %300 = vmatpush3.msra.mxu0 %v54_v15  ;;  %335 = vmatpush3.msra.mxu1 %v146_v20 }
  0x30   :  { %301 = vmatprep.subr.mxu0 %v430_v0  ;;  %336 = vmatprep.subr.mxu1 %v430_v0 }
  0x31   :  { %302 = vmatpush3.msra.mxu0 %v53_v17  ;;  %337 = vmatpush3.msra.mxu1 %v145_v22 }
  0x32   :  { %303 = vmatprep.subr.mxu0 %v430_v0  ;;  %338 = vmatprep.subr.mxu1 %v430_v0 }
  0x33   :  { %304 = vmatpush3.msra.mxu0 %v52_v19  ;;  %339 = vmatpush3.msra.mxu1 %v144_v24 }
  0x34   :  { %305 = vmatprep.subr.mxu0 %v430_v0  ;;  %340 = vmatprep.subr.mxu1 %v430_v0 }
  0x35   :  { %306 = vmatpush3.msra.mxu0 %v51_v21  ;;  %341 = vmatpush3.msra.mxu1 %v143_v26 }
  0x36   :  { %307 = vmatprep.subr.mxu0 %v430_v0  ;;  %342 = vmatprep.subr.mxu1 %v430_v0 }
  0x37   :  { %308 = vmatpush3.msra.mxu0 %v50_v23  ;;  %343 = vmatpush3.msra.mxu1 %v142_v28 }
  0x38   :  { %309 = vmatprep.subr.mxu0 %v430_v0  ;;  %344 = vmatprep.subr.mxu1 %v430_v0 }
  0x39   :  { %310 = vmatpush3.msra.mxu0 %v49_v25  ;;  %345 = vmatpush3.msra.mxu1 %v141_v31 }
  0x3a   :  { %311 = vmatprep.subr.mxu0 %v430_v0  ;;  %346 = vmatprep.subr.mxu1 %v430_v0 }
  0x3b   :  { %312 = vmatpush3.msra.mxu0 %v48_v27  ;;  %347 = vmatpush3.msra.mxu1 %v140_v32 }
  0x3c   :  { %313 = vmatprep.subr.mxu0 %v430_v0  ;;  %348 = vmatprep.subr.mxu1 %v430_v0 }
  0x3d   :  { %314 = vmatpush3.msra.mxu0 %v47_v29  ;;  %349 = vmatpush3.msra.mxu1 %v139_v33 }
  0x3e   :  { %316 = vmatmul.mubr.f32.vlgmr.msra.gmra.mxu0 %v46_v30 }
  0xfe   :  { %v134_v35 = vpop.f32.mrf.mxu0 }
  0xff   :  { %v135_v36 = vadd.f32 %v247_v34, %v134_v35 }
 0x100   :  { %v317_v37 = vpop.f32.mrf.mxu0 }
 0x101   :  { %v138_v38 = vmax.f32 %v135_v36, 0.0 }
 0x103   :  { %351 = vmatmul.mubr.f32.vlgmr.msra.gmra.mxu1 %v138_v38 }
 0x1c3   :  { %v226_v40 = vpop.f32.mrf.mxu1 }
 0x1c4   :  { %v227_v41 = vadd.f32 %v248_v39, %v226_v40 }
 0x1c5   :  { %v352_v42 = vpop.f32.mrf.mxu1 }
 0x1c6   :  { %230 = vst [vmem:[#allocation7] sm:$0xff] %v227_v41 }
 0x1c7   :  { %411 = shalt.err (!%p408_p0)
}
 0x1c8   :  { %240 = dma.vmem_to_hbm [thread:$0]  %s238_s5, 128, %s514_s4, [#allocation4]  }
 0x1c9   :  { %424 = dma.done.wait [#allocation4], 128  }
 0x1ca   :  { %425 = vsyncadd [#allocation4], 4294967168 }
 0x1cb   :  { %244 = vsyncpa [#allocation3], 1 }
 0x1cc   :  { %245 = vsyncpa [#allocation6], 1 }
 0x1cd   :  { %246 = vsyncpa [#allocation4], 1 }

</bundles_post_ra>
